<compile_context>
chip_gen: v7x
topology: tpu7x:2x2x1
jax: 0.10.0
libtpu: 0.0.40
codegen_flags: <defaults>
</compile_context>

<pallas_src>
import functools

import jax
import jax.numpy as jnp
from jax.experimental import pallas as pl
from jax.experimental.pallas import tpu as pltpu


def _pick_tile(dim, max_tile, align):
    """Full-dim block when it fits (always legal), else an aligned tile; the ragged
    tail tile is handled by masked OOB reads/writes."""
    if dim <= max_tile:
        return dim
    return max(align, (max_tile // align) * align)


def _learned_graph_kernel(a1_ref, a2_ref, a3_ref, r_ref, x_ref, w_ref, o_ref):
    # H tile on the MXU in W's storage dtype (bf16 by default), f32 accumulation.
    h = jnp.dot(x_ref[...].astype(w_ref.dtype), w_ref[...],
                preferred_element_type=jnp.float32)            # (tm, tn)
    r = r_ref[...]                                             # (2, tn) f32
    r1 = r[0:1, :]                                             # v^T . D (xW)  tile
    r2 = r[1:2, :]                                             # u^T . D (xW)  tile
    out = a1_ref[...] * r1 + a2_ref[...] * r2 - a3_ref[...] * h
    o_ref[...] = out.astype(o_ref.dtype)


@functools.partial(jax.jit,
                   static_argnames=("backward", "row_tile", "col_tile", "mxu_dtype"))
def learned_graph_forward(w_s, w_r, weight, x, backward=False,
                          row_tile=512, col_tile=512, mxu_dtype=jnp.bfloat16):
    """Pallas implementation of LearnedGraph.forward.

    w_s, w_r : (N, 1) float
    weight   : (in_features, out_features) float
    x        : (N, in_features)
    """
    f32 = jnp.float32
    w_mat = (weight.T if backward else weight).astype(f32)     # (f_in, f_out)
    n, f_in = x.shape
    f_out = w_mat.shape[1]

    u = jnp.abs(w_s).astype(f32).reshape(n, 1)
    v = jnp.abs(w_r).astype(f32).reshape(n, 1)
    sum_u = jnp.sum(u)
    sum_v = jnp.sum(v)

    # Closed-form row sums of A.  NOTE: like the reference, zero degrees map to 1
    # (no epsilon); fp cancellation can send a *tiny* positive degree to exactly 0,
    # which then also maps to d = 1 — documented divergence near zero-degree rows.
    s = 0.5 * (u * sum_v + v * sum_u) - u * v
    s = jnp.maximum(s, 0.0)
    s = jnp.where(s == 0.0, 1.0, s)
    d = jax.lax.rsqrt(s)                                       # (n, 1)

    # Tiny global reductions (O(N*f_in)) + (2,f_in)x(f_in,f_out) matmul in plain XLA
    # f32; this removes all cross-tile coupling from the heavy Pallas pass.
    coeffs = jnp.concatenate([v * d, u * d], axis=1)           # (n, 2)
    y = coeffs.T @ x.astype(f32)                               # (2, f_in)
    r = y @ w_mat                                              # (2, f_out)

    a1 = 0.5 * d * u                                           # multiplies r1
    a2 = 0.5 * d * v                                           # multiplies r2
    a3 = (d * d) * (u * v)                                     # multiplies x @ W

    # W is re-read across row tiles -> store it narrow (bf16 halves its DMA bytes);
    # x stays in its original dtype in HBM and is cast on-chip right before the dot.
    w_mx = w_mat.astype(mxu_dtype)

    tm = _pick_tile(n, row_tile, 8)
    tn = _pick_tile(f_out, col_tile, 128)
    grid = (pl.cdiv(n, tm), pl.cdiv(f_out, tn))

    col_spec = pl.BlockSpec((tm, 1), lambda i, j: (i, 0))
    # NOTE: the x / W block indices are constant along one grid axis, so the pipeline
    # does not re-DMA them every inner step; pl.Buffered(1) on those specs could
    # further halve their VMEM footprint if larger tm/tn are ever needed.
    # TODO(synk): add a K (f_in) grid axis with an f32 accumulator scratch for very
    # large in_features; f_in is kept untiled here.
    out = pl.pallas_call(
        _learned_graph_kernel,
        out_shape=jax.ShapeDtypeStruct((n, f_out), x.dtype),
        grid=grid,
        in_specs=[col_spec,                                          # a1
                  col_spec,                                          # a2
                  col_spec,                                          # a3
                  pl.BlockSpec((2, tn), lambda i, j: (0, j)),        # r
                  pl.BlockSpec((tm, f_in), lambda i, j: (i, 0)),     # x
                  pl.BlockSpec((f_in, tn), lambda i, j: (0, j))],    # W (bf16)
        out_specs=pl.BlockSpec((tm, tn), lambda i, j: (i, j)),
        compiler_params=pltpu.CompilerParams(
            dimension_semantics=("parallel", "parallel"),
            vmem_limit_bytes=64 * 1024 * 1024),
    )(a1, a2, a3, r, x, w_mx)

    return out


def learned_graph_reference(w_s, w_r, weight, x, backward=False):
    """Dense pure-JAX reference replicating the PyTorch module exactly."""
    w_mat = weight.T if backward else weight
    g = w_s @ w_r.T
    a = (jnp.abs(g) + jnp.abs(g).T) / 2.0
    a = a - jnp.diag(jnp.diag(a))
    s = a.sum(axis=1)
    s = jnp.where(s == 0.0, 1.0, s)
    dmat = jnp.diag(s ** -0.5)
    return (dmat @ a @ dmat) @ (x @ w_mat)


if __name__ == "__main__":
    # Small deterministic setup consistent with LearnedGraph(in_features, out_features, N)
    N, in_features, out_features = 8, 32, 16

    key = jax.random.PRNGKey(0)
    k_ws, k_wr, k_w, k_x = jax.random.split(key, 4)

    # torch.nn.init.uniform_ -> U(0, 1) for w_s, w_r
    w_s = jax.random.uniform(k_ws, (N, 1), dtype=jnp.float32)
    w_r = jax.random.uniform(k_wr, (N, 1), dtype=jnp.float32)
    # self.weight is torch.empty in the module; init deterministically here.
    weight = jax.random.normal(k_w, (in_features, out_features), dtype=jnp.float32) * 0.1
    x = jax.random.normal(k_x, (N, in_features), dtype=jnp.float32)

    out = learned_graph_forward(w_s, w_r, weight, x, backward=False)
    out = jax.block_until_ready(out)

    ref = learned_graph_reference(w_s, w_r, weight, x, backward=False)
    assert out.shape == (N, out_features)
    # MXU operands are bf16 (f32 accumulation, f32 rank-2 combine) -> bf16-level tol.
    assert jnp.allclose(out, ref, atol=5e-3, rtol=5e-3), "mismatch vs reference"

    print("KERNEL_OK")
</pallas_src>

<mosaic_0001>
module attributes {stable_mosaic.version = 11 : i64} {
  func.func @_learned_graph_kernel(%arg0: i32, %arg1: i32, %arg2: memref<8x1xf32, #tpu.memory_space<vmem>>, %arg3: memref<8x1xf32, #tpu.memory_space<vmem>>, %arg4: memref<8x1xf32, #tpu.memory_space<vmem>>, %arg5: memref<2x16xf32, #tpu.memory_space<vmem>>, %arg6: memref<8x32xf32, #tpu.memory_space<vmem>>, %arg7: memref<32x16xbf16, #tpu.memory_space<vmem>>, %arg8: memref<8x16xf32, #tpu.memory_space<vmem>>) attributes {dimension_semantics = [#tpu.dimension_semantics<parallel>, #tpu.dimension_semantics<parallel>], iteration_bounds = array<i64: 1, 1>, scalar_prefetch = 0 : i64, scratch_operands = 0 : i64, tpu.core_type = #tpu.core_type<tc>, window_params = [{transform_indices = @transform_0, window_bounds = array<i64: 8, 1>}, {transform_indices = @transform_1, window_bounds = array<i64: 8, 1>}, {transform_indices = @transform_2, window_bounds = array<i64: 8, 1>}, {transform_indices = @transform_3, window_bounds = array<i64: 2, 16>}, {transform_indices = @transform_4, window_bounds = array<i64: 8, 32>}, {transform_indices = @transform_5, window_bounds = array<i64: 32, 16>}, {transform_indices = @transform_6, window_bounds = array<i64: 8, 16>}]} {
    %c0 = arith.constant 0 : index
    %c0_0 = arith.constant 0 : index
    %0 = vector.load %arg6[%c0, %c0_0] : memref<8x32xf32, #tpu.memory_space<vmem>>, vector<8x32xf32>
    %1 = arith.truncf %0 : vector<8x32xf32> to vector<8x32xbf16>
    %c0_1 = arith.constant 0 : index
    %c0_2 = arith.constant 0 : index
    %2 = vector.load %arg7[%c0_1, %c0_2] : memref<32x16xbf16, #tpu.memory_space<vmem>>, vector<32x16xbf16>
    %cst = arith.constant dense<0.000000e+00> : vector<8x16xf32>
    %3 = tpu.matmul %1, %2, %cst {dimension_numbers = #tpu.dot_dimension_numbers<[1], [0], [0], [1], [0, 0, 1, 1], [], []>} : vector<8x32xbf16>, vector<32x16xbf16>, vector<8x16xf32> -> vector<8x16xf32>
    %c0_3 = arith.constant 0 : index
    %c0_4 = arith.constant 0 : index
    %4 = vector.load %arg5[%c0_3, %c0_4] : memref<2x16xf32, #tpu.memory_space<vmem>>, vector<2x16xf32>
    %5 = vector.extract_strided_slice %4 {offsets = [0, 0], sizes = [1, 16], strides = [1, 1]} : vector<2x16xf32> to vector<1x16xf32>
    %6 = vector.extract_strided_slice %4 {offsets = [1, 0], sizes = [1, 16], strides = [1, 1]} : vector<2x16xf32> to vector<1x16xf32>
    %c0_5 = arith.constant 0 : index
    %c0_6 = arith.constant 0 : index
    %7 = vector.load %arg2[%c0_5, %c0_6] : memref<8x1xf32, #tpu.memory_space<vmem>>, vector<8x1xf32>
    %8 = vector.broadcast %7 : vector<8x1xf32> to vector<8x16xf32>
    %9 = vector.broadcast %5 : vector<1x16xf32> to vector<8x16xf32>
    %10 = arith.mulf %8, %9 : vector<8x16xf32>
    %c0_7 = arith.constant 0 : index
    %c0_8 = arith.constant 0 : index
    %11 = vector.load %arg3[%c0_7, %c0_8] : memref<8x1xf32, #tpu.memory_space<vmem>>, vector<8x1xf32>
    %12 = vector.broadcast %11 : vector<8x1xf32> to vector<8x16xf32>
    %13 = vector.broadcast %6 : vector<1x16xf32> to vector<8x16xf32>
    %14 = arith.mulf %12, %13 : vector<8x16xf32>
    %15 = arith.addf %10, %14 : vector<8x16xf32>
    %c0_9 = arith.constant 0 : index
    %c0_10 = arith.constant 0 : index
    %16 = vector.load %arg4[%c0_9, %c0_10] : memref<8x1xf32, #tpu.memory_space<vmem>>, vector<8x1xf32>
    %17 = vector.broadcast %16 : vector<8x1xf32> to vector<8x16xf32>
    %18 = arith.mulf %17, %3 : vector<8x16xf32>
    %19 = arith.subf %15, %18 : vector<8x16xf32>
    %c0_11 = arith.constant 0 : index
    %c0_12 = arith.constant 0 : index
    %20 = vector.load %arg8[%c0_11, %c0_12] : memref<8x16xf32, #tpu.memory_space<vmem>>, vector<8x16xf32>
    tpu.vector_store %arg8[%c0_11, %c0_12], %19 {strides = array<i32>} : memref<8x16xf32, #tpu.memory_space<vmem>>, vector<8x16xf32>,
    return
  }
  func.func @transform_0(%arg0: i32, %arg1: i32) -> (i32, i32) {
    %c0_i32 = arith.constant 0 : i32
    %c0_i32_0 = arith.constant 0 : i32
    return %arg0, %c0_i32 : i32, i32
  }
  func.func @transform_1(%arg0: i32, %arg1: i32) -> (i32, i32) {
    %c0_i32 = arith.constant 0 : i32
    %c0_i32_0 = arith.constant 0 : i32
    return %arg0, %c0_i32 : i32, i32
  }
  func.func @transform_2(%arg0: i32, %arg1: i32) -> (i32, i32) {
    %c0_i32 = arith.constant 0 : i32
    %c0_i32_0 = arith.constant 0 : i32
    return %arg0, %c0_i32 : i32, i32
  }
  func.func @transform_3(%arg0: i32, %arg1: i32) -> (i32, i32) {
    %c0_i32 = arith.constant 0 : i32
    %c0_i32_0 = arith.constant 0 : i32
    return %c0_i32, %arg1 : i32, i32
  }
  func.func @transform_4(%arg0: i32, %arg1: i32) -> (i32, i32) {
    %c0_i32 = arith.constant 0 : i32
    %c0_i32_0 = arith.constant 0 : i32
    return %arg0, %c0_i32 : i32, i32
  }
  func.func @transform_5(%arg0: i32, %arg1: i32) -> (i32, i32) {
    %c0_i32 = arith.constant 0 : i32
    %c0_i32_0 = arith.constant 0 : i32
    return %c0_i32, %arg1 : i32, i32
  }
  func.func @transform_6(%arg0: i32, %arg1: i32) -> (i32, i32) {
    %c0_i32 = arith.constant 0 : i32
    return %arg0, %arg1 : i32, i32
  }
}

</mosaic_0001>

<bundles_post_ra>
// kernel: learned_graph_forward.1
= control target key start
LH: loop header
LB: loop body
LE: loop exit
PB: predicated region body
PF: predicated region fallthrough
CT: control target
= control target key end

     0   :  { %11 = vsyncpa [#allocation3], 0  ;;  %s543_s0 = inlined_call_operand.hbm [shape: f32[8,1], index: 0, kind: input, shape index: {}]   ;;  %s544_s1 = inlined_call_operand.hbm [shape: f32[8,1], index: 1, kind: input, shape index: {}]   ;;  %s545_s2 = inlined_call_operand.hbm [shape: f32[8,1], index: 2, kind: input, shape index: {}]   ;;  %s546_s3 = inlined_call_operand.hbm [shape: f32[2,16], index: 3, kind: input, shape index: {}]   ;;  %s547_s4 = inlined_call_operand.hbm [shape: f32[8,32], index: 4, kind: input, shape index: {}]   ;;  %s548_s5 = inlined_call_operand.hbm [shape: bf16[32,16], index: 5, kind: input, shape index: {}]   ;;  %s549_s6 = inlined_call_operand.hbm [shape: f32[8,16], index: 6, kind: output, shape index: {}]  }
   0x1   :  { %12 = vsyncpa [#allocation6], 0 }
   0x2   :  { %13 = vsyncpa [#allocation9], 0 }
   0x3   :  { %14 = vsyncpa [#allocation12], 0 }
   0x4   :  { %15 = vsyncpa [#allocation4], 0  ;;  %s405_s21 = smov [#allocation5]   ;;  %s406_s23 = smov [#allocation8]  }
   0x5   :  { %s32_s22 = sshll.u32 %s405_s21, 4  ;;  %s52_s24 = sshll.u32 %s406_s23, 4  ;;  %s33_s22 = int_to_ptr.vmem [resolvable:$true] %s32_s22  ;;  %s53_s24 = int_to_ptr.vmem [resolvable:$true] %s52_s24 }
   0x6   :  { %s241_s27 = scalar_lea.hbm %s544_s1, 128 }
   0x7   :  { %p242_p0 = scmp.ne.s32.totalorder %s544_s1, %s241_s27  ;;  %p245_p1 = scmp.lt.u32.totalorder %s241_s27, %s544_s1 }
   0x9   :  { %p247_p2 = pnand %p245_p1, %p242_p0 }
   0xb   :  { %250 = shalt.err (!%p247_p2)
}
   0xc   :  { %s251_s8 = scalar_lea.vmem %s33_s22, 128  ;;  %p256_p4 = scmp.lt.s32.totalorder %s33_s22, %s33_s22 }
   0xd   :  { %p252_p3 = scmp.ne.s32.totalorder %s33_s22, %s251_s8  ;;  %p257_p5 = scmp.lt.s32.totalorder %s251_s8, %s251_s8 }
   0xf   :  { %p258_p6 = por %p257_p5, %p256_p4 }
  0x11   :  { %p259_p7 = pnand %p258_p6, %p252_p3 }
  0x13   :  { %262 = shalt.err (!%p259_p7)
}
  0x14   :  { %35 = dma.hbm_to_vmem [thread:$0]  %s544_s1, 128, %s33_s22, [#allocation6]  }
  0x15   :  { %s263_s13 = scalar_lea.hbm %s546_s3, 32 }
  0x16   :  { %p264_p8 = scmp.ne.s32.totalorder %s546_s3, %s263_s13  ;;  %p267_p9 = scmp.lt.u32.totalorder %s263_s13, %s546_s3 }
  0x18   :  { %p269_p10 = pnand %p267_p9, %p264_p8 }
  0x1a   :  { %272 = shalt.err (!%p269_p10)
}
  0x1b   :  { %s273_s18 = scalar_lea.vmem %s53_s24, 32  ;;  %p278_p12 = scmp.lt.s32.totalorder %s53_s24, %s53_s24 }
  0x1c   :  { %p274_p11 = scmp.ne.s32.totalorder %s53_s24, %s273_s18  ;;  %p279_p13 = scmp.lt.s32.totalorder %s273_s18, %s273_s18 }
  0x1e   :  { %p280_p0 = por %p279_p13, %p278_p12 }
  0x20   :  { %p281_p1 = pnand %p280_p0, %p274_p11 }
  0x22   :  { %284 = shalt.err (!%p281_p1)
}
  0x23   :  { %55 = dma.hbm_to_vmem [thread:$0]  %s546_s3, 32, %s53_s24, [#allocation9]  }
  0x24   :  { %s407_s20 = smov [#allocation2]   ;;  %s408_s22 = smov [#allocation7]  }
  0x25   :  { %s22_s21 = sshll.u32 %s407_s20, 4  ;;  %s42_s23 = sshll.u32 %s408_s22, 4  ;;  %s23_s21 = int_to_ptr.vmem [resolvable:$true] %s22_s21  ;;  %s43_s23 = int_to_ptr.vmem [resolvable:$true] %s42_s23 }
  0x26   :  { %s285_s27 = scalar_lea.hbm %s543_s0, 128 }
  0x27   :  { %p286_p2 = scmp.ne.s32.totalorder %s543_s0, %s285_s27  ;;  %p289_p3 = scmp.lt.u32.totalorder %s285_s27, %s543_s0 }
  0x29   :  { %p291_p4 = pnand %p289_p3, %p286_p2 }
  0x2b   :  { %294 = shalt.err (!%p291_p4)
}
  0x2c   :  { %s295_s3 = scalar_lea.vmem %s23_s21, 128  ;;  %p300_p6 = scmp.lt.s32.totalorder %s23_s21, %s23_s21 }
  0x2d   :  { %p296_p5 = scmp.ne.s32.totalorder %s23_s21, %s295_s3  ;;  %p301_p7 = scmp.lt.s32.totalorder %s295_s3, %s295_s3 }
  0x2f   :  { %p302_p8 = por %p301_p7, %p300_p6 }
  0x31   :  { %p303_p9 = pnand %p302_p8, %p296_p5 }
  0x33   :  { %306 = shalt.err (!%p303_p9)
}
  0x34   :  { %25 = dma.hbm_to_vmem [thread:$0]  %s543_s0, 128, %s23_s21, [#allocation3]  }
  0x35   :  { %s307_s11 = scalar_lea.hbm %s545_s2, 128 }
  0x36   :  { %p308_p10 = scmp.ne.s32.totalorder %s545_s2, %s307_s11  ;;  %p311_p11 = scmp.lt.u32.totalorder %s307_s11, %s545_s2 }
  0x38   :  { %p313_p12 = pnand %p311_p11, %p308_p10 }
  0x3a   :  { %316 = shalt.err (!%p313_p12)
}
  0x3b   :  { %s317_s16 = scalar_lea.vmem %s43_s23, 128  ;;  %p322_p0 = scmp.lt.s32.totalorder %s43_s23, %s43_s23 }
  0x3c   :  { %p318_p13 = scmp.ne.s32.totalorder %s43_s23, %s317_s16  ;;  %p323_p1 = scmp.lt.s32.totalorder %s317_s16, %s317_s16 }
  0x3e   :  { %p324_p2 = por %p323_p1, %p322_p0 }
  0x40   :  { %p325_p3 = pnand %p324_p2, %p318_p13 }
  0x42   :  { %328 = shalt.err (!%p325_p3)
}
  0x43   :  { %45 = dma.hbm_to_vmem [thread:$0]  %s545_s2, 128, %s43_s23, [#allocation6]  }
  0x44   :  { %s409_s18 = smov [#allocation10]   ;;  %s410_s19 = smov [#allocation11]  }
  0x45   :  { %s62_s1 = sshll.u32 %s409_s18, 4  ;;  %s71_s20 = sshll.u32 %s410_s19, 4  ;;  %s63_s1 = int_to_ptr.vmem [resolvable:$true] %s62_s1  ;;  %s500_s20 = int_to_ptr.vmem [resolvable:$true] %s71_s20 }
  0x46   :  { %s329_s25 = scalar_lea.hbm %s547_s4, 128 }
  0x47   :  { %p330_p4 = scmp.ne.s32.totalorder %s547_s4, %s329_s25  ;;  %p333_p5 = scmp.lt.u32.totalorder %s329_s25, %s547_s4 }
  0x49   :  { %p335_p6 = pnand %p333_p5, %p330_p4 }
  0x4b   :  { %338 = shalt.err (!%p335_p6)
}
  0x4c   :  { %s339_s2 = scalar_lea.vmem %s63_s1, 128  ;;  %p344_p8 = scmp.lt.s32.totalorder %s63_s1, %s63_s1 }
  0x4d   :  { %p340_p7 = scmp.ne.s32.totalorder %s63_s1, %s339_s2  ;;  %p345_p9 = scmp.lt.s32.totalorder %s339_s2, %s339_s2 }
  0x4f   :  { %p346_p10 = por %p345_p9, %p344_p8 }
  0x51   :  { %p347_p11 = pnand %p346_p10, %p340_p7 }
  0x53   :  { %350 = shalt.err (!%p347_p11)
}
  0x54   :  { %65 = dma.hbm_to_vmem [thread:$0]  %s547_s4, 128, %s63_s1, [#allocation9]  }
  0x55   :  { %s351_s24 = scalar_lea.hbm %s548_s5, 256 }
  0x56   :  { %p352_p12 = scmp.ne.s32.totalorder %s548_s5, %s351_s24  ;;  %p355_p13 = scmp.lt.u32.totalorder %s351_s24, %s548_s5 }
  0x58   :  { %p357_p0 = pnand %p355_p13, %p352_p12 }
  0x5a   :  { %360 = shalt.err (!%p357_p0)
}
  0x5b   :  { %s361_s12 = scalar_lea.vmem %s500_s20, 256  ;;  %p366_p2 = scmp.lt.s32.totalorder %s500_s20, %s500_s20 }
  0x5c   :  { %p362_p1 = scmp.ne.s32.totalorder %s500_s20, %s361_s12  ;;  %p367_p3 = scmp.lt.s32.totalorder %s361_s12, %s361_s12 }
  0x5e   :  { %p368_p4 = por %p367_p3, %p366_p2 }
  0x60   :  { %p369_p5 = pnand %p368_p4, %p362_p1 }
  0x62   :  { %372 = shalt.err (!%p369_p5)
}
  0x63   :  { %s411_s4 = smov 64   ;;  %s412_s13 = smov 4  }
  0x64   :  { %77 = dma.hbm_to_vmem [thread:$0]  %s548_s5, 256, %s500_s20, [#allocation12], %s411_s4, %s411_s4, %s412_s13  }
  0x65   :  { %395 = dma.done.wait [#allocation3], 128  }
  0x66   :  { %396 = vsyncadd [#allocation3], 4294967168 }
  0x67   :  { %397 = dma.done.wait [#allocation6], 256  }
  0x68   :  { %398 = vsyncadd [#allocation6], 4294967040 }
  0x69   :  { %399 = dma.done.wait [#allocation9], 160  }
  0x6a   :  { %400 = vsyncadd [#allocation9], 4294967136 }
  0x6b   :  { %401 = dma.done.wait [#allocation12], 256  }
  0x6c   :  { %402 = vsyncadd [#allocation12], 4294967040  ;;  %v413_v0 = vmov 0.0   ;;  %vm414_vm0 = vmmov 0   ;;  %v415_v1 = vmov 0   ;;  %v239_v2 = vld [vmem:[#allocation11] sm:$0xff]   ;;  %v166_v9 = vlaneseq }
  0x6d   :  { %217 = vmatprep.subr.bf16.mxu0 %v413_v0  ;;  %221 = vmatprep.mubr.msk.bf16.mxu0 %vm414_vm0, %v413_v0  ;;  %v240_v3 = vld [vmem:[#allocation11 + $0x8] sm:$0xff]   ;;  %v97_v4 = vld [vmem:[#allocation10] sm:$0xff]  ;;  %vm115_vm1 = vcmask 261120   ;;  %v159_v14 = vld [vmem:[#allocation8] sm:$0x3]  ;;  %s416_s5 = smov [#allocation13]  }
  0x6e   :  { %237 = vset.pattern.permute.xlu0 %v415_v1  ;;  %238 = vset.pattern.permute.xlu1 %v415_v1  ;;  %v160_v5 = vld [vmem:[#allocation2] sm:$0xff]  ;;  %v183_v6 = vld [vmem:[#allocation7] sm:$0xff]  ;;  %v171_v7 = vld [vmem:[#allocation5] sm:$0xff]  ;;  %v98_v8 = vpack.c.bf16 %v97_v4, %v97_v4  ;;  %v167_v10 = vshrl.u32 %v166_v9, 7  ;;  %s199_s16 = sshll.u32 %s416_s5, 4  ;;  %vm191_vm2 = vcmask 130048   ;;  %s200_s16 = int_to_ptr.vmem [resolvable:$true] %s199_s16 }
  0x6f   :  { %218 = vmatpush3.bf16.msra.mxu0 %v239_v2  ;;  %163 = vperm.xlu0 %237, %v160_v5   ;;  %s373_s0 = scalar_lea.vmem %s200_s16, 128  ;;  %p378_p7 = scmp.lt.s32.totalorder %s200_s16, %s200_s16 }
  0x70   :  { %219 = vmatprep.subr.bf16.mxu0 %v413_v0  ;;  %186 = vperm.xlu1 %238, %v183_v6   ;;  %v168_v12 = vsub.s32 0, %v167_v10  ;;  %v179_v13 = vsub.s32 1, %v167_v10  ;;  %p374_p6 = scmp.ne.s32.totalorder %s200_s16, %s373_s0  ;;  %p379_p8 = scmp.lt.s32.totalorder %s373_s0, %s373_s0 }
  0x72   :  { %v169_v15 = vrot.slane %v159_v14, %v168_v12  ;;  %v180_v16 = vrot.slane %v159_v14, %v179_v13  ;;  %p380_p9 = por %p379_p8, %p378_p7 }
  0x73   :  { %220 = vmatpush3.bf16.msra.mxu0 %v240_v3  ;;  %174 = vperm.xlu0 %237, %v171_v7  }
  0x74   :  { %p381_p10 = pnand %p380_p9, %p374_p6 }
  0x76   :  { %222 = vmatmul.mubr.msk.bf16.vlgmr.msra.gmra.mrb[0].mxu0 %vm115_vm1, %v98_v8 }
  0xee   :  { %v164_v11 = vpop.permute.xlu0 %163 }
  0xef   :  { %v170_v18 = vmul.f32 %v169_v15, %v164_v11  ;;  %v187_v20 = vpop.permute.xlu1 %186 }
  0xf2   :  { %v175_v17 = vpop.permute.xlu0 %174 }
  0xf3   :  { %v181_v19 = vmul.f32 %v180_v16, %v175_v17 }
  0xf5   :  { %v182_v22 = vadd.f32 %v181_v19, %v170_v18 }
 0x149   :  { %v153_v21 = vpop.f32.mrb[0].mxu0 }
 0x14a   :  { %v189_v23 = vmul.f32 %v187_v20, %v153_v21  ;;  %v223_v24 = vpop.f32.mrb[1].mxu0 }
 0x14b   :  { %v156_v25 = vpop.f32.mrb[2].mxu0 }
 0x14c   :  { %v190_v26 = vsub.f32 %v182_v22, %v189_v23  ;;  %v224_v27 = vpop.f32.mrb[3].mxu0 }
 0x14e   :  { %192 = vst.msk [vmem:[#allocation13] sm:$0xff] %vm191_vm2, %v190_v26 }
 0x14f   :  { %384 = shalt.err (!%p381_p10)
}
 0x150   :  { %s385_s1 = scalar_lea.hbm %s549_s6, 128 }
 0x151   :  { %p386_p11 = scmp.ne.s32.totalorder %s549_s6, %s385_s1  ;;  %p389_p12 = scmp.lt.u32.totalorder %s385_s1, %s549_s6 }
 0x153   :  { %p391_p13 = pnand %p389_p12, %p386_p11 }
 0x155   :  { %394 = shalt.err (!%p391_p13)
}
 0x156   :  { %202 = dma.vmem_to_hbm [thread:$0]  %s200_s16, 128, %s549_s6, [#allocation4]  }
 0x157   :  { %403 = dma.done.wait [#allocation4], 128  }
 0x158   :  { %404 = vsyncadd [#allocation4], 4294967168 }
 0x159   :  { %206 = vsyncpa [#allocation3], 1 }
 0x15a   :  { %207 = vsyncpa [#allocation6], 1 }
 0x15b   :  { %208 = vsyncpa [#allocation9], 1 }
 0x15c   :  { %209 = vsyncpa [#allocation12], 1 }
 0x15d   :  { %210 = vsyncpa [#allocation4], 1 }

</bundles_post_ra>
